<compile_context>
chip_gen: v7x
topology: tpu7x:2x2x1
jax: 0.10.0
libtpu: 0.0.40
codegen_flags: <defaults>
</compile_context>

<pallas_src>
import functools

import jax
import jax.numpy as jnp
from jax.experimental import pallas as pl
from jax.experimental.pallas import tpu as pltpu

BN_EPS = 1e-5  # nn.BatchNorm1d default eps


def _const_spec(arr):
    """Whole-array block whose block index never changes -> stays VMEM-resident."""
    zeros = (0,) * arr.ndim
    return pl.BlockSpec(arr.shape, lambda i: zeros)


def _hidden_tile(xt, wc1t_ref, bc1t_ref, w1ct_ref, w1rt_ref, b1t_ref):
    """Pre-activation hidden h^T for one token tile, channels-major: (h2, TM)."""
    f32 = jnp.float32
    # shared_coor_encoder layer 1 (rows of wc1 for non-coor features are zero).
    c = jnp.dot(wc1t_ref[...], xt, preferred_element_type=f32) + bc1t_ref[...]
    c = jnp.maximum(c, 0.0)                                    # (h4, TM)
    # fea_MLP.w_1 with wc2/bc2 folded in + raw features (w1r zero-padded rows).
    return (jnp.dot(w1ct_ref[...], c, preferred_element_type=f32)
            + jnp.dot(w1rt_ref[...], xt, preferred_element_type=f32)
            + b1t_ref[...])                                    # (h2, TM)


def _stats_kernel(xt_ref, wc1t_ref, bc1t_ref, w1ct_ref, w1rt_ref, b1t_ref,
                  sum_ref, sq_ref, *, m_true, tm, masked):
    i = pl.program_id(0)

    @pl.when(i == 0)
    def _init():
        sum_ref[...] = jnp.zeros_like(sum_ref)
        sq_ref[...] = jnp.zeros_like(sq_ref)

    h = _hidden_tile(xt_ref[...], wc1t_ref, bc1t_ref, w1ct_ref, w1rt_ref, b1t_ref)
    if masked:  # zero out padded token columns (static decision at trace time)
        col = jax.lax.broadcasted_iota(jnp.int32, h.shape, 1) + i * tm
        h = jnp.where(col < m_true, h, 0.0)
    # single-traversal sum / sum-of-squares; lane-axis reduce runs on the XLU.
    sum_ref[...] += jnp.sum(h, axis=1, keepdims=True)
    sq_ref[...] += jnp.sum(h * h, axis=1, keepdims=True)


def _output_kernel(xt_ref, wc1t_ref, bc1t_ref, w1cs_ref, w1rs_ref, b1s_ref,
                   w2t_ref, b2t_ref, out_ref):
    # Layer-1 weights here already carry the BN scale/shift (folded in wrapper),
    # so this is just matmul -> ReLU -> matmul, fully lane-dense.
    h = _hidden_tile(xt_ref[...], wc1t_ref, bc1t_ref, w1cs_ref, w1rs_ref, b1s_ref)
    y = jnp.maximum(h, 0.0)                                     # BN affine folded + ReLU
    out_ref[...] = (jnp.dot(w2t_ref[...], y, preferred_element_type=jnp.float32)
                    + b2t_ref[...])                             # (hidden, TM) lane-dense


def road2embedding_forward(x, params, *, input_dim, hidden_dim, tile_m=1024):
    """x: (N, 16, input_dim - 1) f32. Returns (N, hidden_dim, 16) f32."""
    n, seq, feat = x.shape
    assert feat == input_dim - 1
    assert tile_m % 128 == 0

    if n == 0:
        # TODO(synk): the literal PyTorch module returns (0, input_dim-1, 16)
        # here (fea_MLP never runs on the empty tensor); we return the
        # hidden-dim shape so the empty and non-empty paths agree.
        return jnp.zeros((0, hidden_dim, seq), jnp.float32)

    h4 = hidden_dim // 4
    h2 = hidden_dim // 2
    m = n * seq
    f32 = jnp.float32

    # ---- parameter packing (tiny; fused by XLA) -----------------------------
    # Fold shared_coor_encoder layer 2 into fea_MLP.w_1 (no nonlinearity between).
    w1c_fold = params["wc2"] @ params["w1_coor"]                       # (h4, h2)
    b1_fold = params["b1"] + params["bc2"] @ params["w1_coor"]         # (1, h2)
    # Zero-pad the feature-split weights so x is one contiguous kernel operand.
    wc1_pad = jnp.concatenate(
        [params["wc1"], jnp.zeros((feat - 3, h4), f32)], axis=0)       # (feat, h4)
    w1r_pad = jnp.concatenate(
        [jnp.zeros((3, h2), f32), params["w1_rest"]], axis=0)          # (feat, h2)

    # Channels-major (transposed) operands: tokens go on the lane axis.
    wc1_t = wc1_pad.T                                                  # (h4, feat)
    bc1_t = params["bc1"].reshape(h4, 1)
    w1c_t = w1c_fold.T                                                 # (h2, h4)
    w1r_t = w1r_pad.T                                                  # (h2, feat)
    b1_t = b1_fold.reshape(h2, 1)
    w2_t = params["w2"].T                                              # (hidden, h2)
    b2_t = params["b2"].reshape(hidden_dim, 1)

    x_t = x.reshape(m, feat).T                                         # (feat, M)

    # ---- token tiling -------------------------------------------------------
    if m <= tile_m:
        tm, m_pad = m, m
    else:
        tm = tile_m
        m_pad = pl.cdiv(m, tm) * tm
        if m_pad != m:
            x_t = jnp.pad(x_t, ((0, 0), (0, m_pad - m)))
    n_tiles = m_pad // tm
    masked = m_pad != m

    weight_args = (wc1_t, bc1_t, w1c_t, w1r_t, b1_t)
    weight_specs = [_const_spec(a) for a in weight_args]
    x_spec = pl.BlockSpec((feat, tm), lambda i: (0, i))

    # ---- pass 1: BatchNorm1d batch statistics over all N*16 tokens ---------
    sums, sqs = pl.pallas_call(
        functools.partial(_stats_kernel, m_true=m, tm=tm, masked=masked),
        out_shape=(jax.ShapeDtypeStruct((h2, 1), f32),
                   jax.ShapeDtypeStruct((h2, 1), f32)),
        grid=(n_tiles,),
        in_specs=[x_spec] + weight_specs,
        out_specs=(pl.BlockSpec((h2, 1), lambda i: (0, 0)),
                   pl.BlockSpec((h2, 1), lambda i: (0, 0))),
        compiler_params=pltpu.CompilerParams(
            dimension_semantics=("arbitrary",),
            vmem_limit_bytes=32 * 1024 * 1024),
    )(x_t, *weight_args)

    mean = sums / m
    var = jnp.maximum(sqs / m - mean * mean, 0.0)   # biased var (torch training fwd)
    inv = jax.lax.rsqrt(var + BN_EPS)
    scale = params["gamma"].reshape(h2, 1) * inv                        # (h2, 1)
    shift = params["beta"].reshape(h2, 1) - mean * scale                # (h2, 1)

    # Fold the BN affine into the layer-1 weights for pass 2:
    #   scale * (A c + B x + b) + shift == (scale*A) c + (scale*B) x + (scale*b + shift)
    w1c_s = w1c_t * scale
    w1r_s = w1r_t * scale
    b1_s = b1_t * scale + shift
    scaled_args = (wc1_t, bc1_t, w1c_s, w1r_s, b1_s)

    # ---- pass 2: (folded BN) + ReLU + fea_MLP.w_2, lane-dense output -------
    out_t = pl.pallas_call(
        _output_kernel,
        out_shape=jax.ShapeDtypeStruct((hidden_dim, m_pad), f32),
        grid=(n_tiles,),
        in_specs=([x_spec] + [_const_spec(a) for a in scaled_args]
                  + [_const_spec(w2_t), _const_spec(b2_t)]),
        out_specs=pl.BlockSpec((hidden_dim, tm), lambda i: (0, i)),
        compiler_params=pltpu.CompilerParams(
            dimension_semantics=("parallel",),
            vmem_limit_bytes=32 * 1024 * 1024),
    )(x_t, *scaled_args, w2_t, b2_t)

    if masked:
        out_t = out_t[:, :m]

    # (hidden, N*16) -> (hidden, N, 16) -> (N, hidden, 16): major-dim permute,
    # equivalent to PyTorch's (N, 16, hidden).transpose(1, 2).
    return jnp.transpose(out_t.reshape(hidden_dim, n, seq), (1, 0, 2))


def init_params(key, *, input_dim, hidden_dim):
    h4 = hidden_dim // 4
    h2 = hidden_dim // 2
    d_mlp_in = input_dim - 4 + h4
    ks = jax.random.split(key, 8)

    def w(k, shape, fan_in):
        return (jax.random.uniform(k, shape, jnp.float32, -1.0, 1.0)
                / jnp.sqrt(jnp.float32(fan_in)))

    w1_full = w(ks[4], (d_mlp_in, h2), d_mlp_in)
    return {
        # TODO(synk): shared_coor_encoder is an external module passed into
        # forward(); it is modeled here as a deterministic 2-layer MLP 3->h4->h4.
        "wc1": w(ks[0], (3, h4), 3),
        "bc1": w(ks[1], (1, h4), 3),
        "wc2": w(ks[2], (h4, h4), h4),
        "bc2": w(ks[3], (1, h4), h4),
        # fea_MLP.w_1 split into the coor-feature rows and the raw-feature rows
        "w1_coor": w1_full[:h4, :],
        "w1_rest": w1_full[h4:, :],
        "b1": w(ks[5], (1, h2), d_mlp_in),
        # BN1D affine params (freshly-initialized BatchNorm1d: gamma=1, beta=0)
        "gamma": jnp.ones((1, h2), jnp.float32),
        "beta": jnp.zeros((1, h2), jnp.float32),
        # fea_MLP.w_2
        "w2": w(ks[6], (h2, hidden_dim), h2),
        "b2": w(ks[7], (1, hidden_dim), h2),
    }


def reference_forward(x, params, *, input_dim, hidden_dim):
    """Pure-JAX, unfolded, token-major reference (matches the PyTorch math)."""
    n, seq, feat = x.shape
    x2 = x.reshape(n * seq, feat)
    c = jnp.maximum(x2[:, :3] @ params["wc1"] + params["bc1"], 0.0)
    coor_fea = c @ params["wc2"] + params["bc2"]
    h = (coor_fea @ params["w1_coor"] + x2[:, 3:] @ params["w1_rest"]
         + params["b1"])
    mean = jnp.mean(h, axis=0, keepdims=True)
    var = jnp.mean((h - mean) ** 2, axis=0, keepdims=True)
    h = (h - mean) / jnp.sqrt(var + BN_EPS) * params["gamma"] + params["beta"]
    h = jnp.maximum(h, 0.0)
    out = h @ params["w2"] + params["b2"]
    return jnp.transpose(out.reshape(n, seq, hidden_dim), (0, 2, 1))


if __name__ == "__main__":
    INPUT_DIM = 10       # road node feature width is input_dim - 1 = 9
    HIDDEN_DIM = 32
    SEQ = 16

    key = jax.random.PRNGKey(0)
    k_x, k_p = jax.random.split(key)
    params = init_params(k_p, input_dim=INPUT_DIM, hidden_dim=HIDDEN_DIM)

    def check(n_roads, tile_m):
        x = jax.random.normal(jax.random.fold_in(k_x, n_roads),
                              (n_roads, SEQ, INPUT_DIM - 1), jnp.float32)
        fwd = jax.jit(functools.partial(
            road2embedding_forward, input_dim=INPUT_DIM,
            hidden_dim=HIDDEN_DIM, tile_m=tile_m))
        out = jax.block_until_ready(fwd(x, params))
        ref = reference_forward(x, params, input_dim=INPUT_DIM,
                                hidden_dim=HIDDEN_DIM)
        assert out.shape == (n_roads, HIDDEN_DIM, SEQ), out.shape
        assert jnp.allclose(out, ref, atol=1e-3, rtol=1e-3), \
            f"mismatch vs reference (n_roads={n_roads})"

    check(4, 512)    # single-tile path (M = 64 tokens, block == full array)
    check(40, 256)   # multi-tile + masked-padding path (M = 640 -> 3 tiles of 256)
    check(64, 256)   # multi-tile, exactly divisible path (M = 1024 -> 4 tiles)
    print("KERNEL_OK")
</pallas_src>

<mosaic_0001>
module attributes {stable_mosaic.version = 11 : i64} {
  func.func @_stats_kernel(%arg0: i32, %arg1: memref<9x64xf32, #tpu.memory_space<vmem>>, %arg2: memref<8x9xf32, #tpu.memory_space<vmem>>, %arg3: memref<8x1xf32, #tpu.memory_space<vmem>>, %arg4: memref<16x8xf32, #tpu.memory_space<vmem>>, %arg5: memref<16x9xf32, #tpu.memory_space<vmem>>, %arg6: memref<16x1xf32, #tpu.memory_space<vmem>>, %arg7: memref<16x1xf32, #tpu.memory_space<vmem>>, %arg8: memref<16x1xf32, #tpu.memory_space<vmem>>) attributes {dimension_semantics = [#tpu.dimension_semantics<arbitrary>], iteration_bounds = array<i64: 1>, scalar_prefetch = 0 : i64, scratch_operands = 0 : i64, tpu.core_type = #tpu.core_type<tc>, window_params = [{transform_indices = @transform_0, window_bounds = array<i64: 9, 64>}, {pipeline_mode = #tpu.pipeline_mode<synchronous>, transform_indices = @transform_1, window_bounds = array<i64: 8, 9>}, {pipeline_mode = #tpu.pipeline_mode<synchronous>, transform_indices = @transform_2, window_bounds = array<i64: 8, 1>}, {pipeline_mode = #tpu.pipeline_mode<synchronous>, transform_indices = @transform_3, window_bounds = array<i64: 16, 8>}, {pipeline_mode = #tpu.pipeline_mode<synchronous>, transform_indices = @transform_4, window_bounds = array<i64: 16, 9>}, {pipeline_mode = #tpu.pipeline_mode<synchronous>, transform_indices = @transform_5, window_bounds = array<i64: 16, 1>}, {pipeline_mode = #tpu.pipeline_mode<synchronous>, transform_indices = @transform_6, window_bounds = array<i64: 16, 1>}, {pipeline_mode = #tpu.pipeline_mode<synchronous>, transform_indices = @transform_7, window_bounds = array<i64: 16, 1>}]} {
    %c0_i32 = arith.constant 0 : i32
    %0 = arith.cmpi eq, %arg0, %c0_i32 : i32
    %1 = arith.extui %0 : i1 to i32
    %c0_i32_0 = arith.constant 0 : i32
    %2 = arith.cmpi ne, %1, %c0_i32_0 : i32
    scf.if %2 {
      %cst_25 = arith.constant 0.000000e+00 : f32
      %30 = vector.broadcast %cst_25 : f32 to vector<16x1xf32>
      %c0_26 = arith.constant 0 : index
      %c0_27 = arith.constant 0 : index
      %31 = vector.load %arg7[%c0_26, %c0_27] : memref<16x1xf32, #tpu.memory_space<vmem>>, vector<16x1xf32>
      tpu.vector_store %arg7[%c0_26, %c0_27], %30 {strides = array<i32>} : memref<16x1xf32, #tpu.memory_space<vmem>>, vector<16x1xf32>,
      %cst_28 = arith.constant 0.000000e+00 : f32
      %32 = vector.broadcast %cst_28 : f32 to vector<16x1xf32>
      %c0_29 = arith.constant 0 : index
      %c0_30 = arith.constant 0 : index
      %33 = vector.load %arg8[%c0_29, %c0_30] : memref<16x1xf32, #tpu.memory_space<vmem>>, vector<16x1xf32>
      tpu.vector_store %arg8[%c0_29, %c0_30], %32 {strides = array<i32>} : memref<16x1xf32, #tpu.memory_space<vmem>>, vector<16x1xf32>,
    } else {
    }
    %c0 = arith.constant 0 : index
    %c0_1 = arith.constant 0 : index
    %3 = vector.load %arg1[%c0, %c0_1] : memref<9x64xf32, #tpu.memory_space<vmem>>, vector<9x64xf32>
    %c0_2 = arith.constant 0 : index
    %c0_3 = arith.constant 0 : index
    %4 = vector.load %arg2[%c0_2, %c0_3] : memref<8x9xf32, #tpu.memory_space<vmem>>, vector<8x9xf32>
    %cst = arith.constant dense<0.000000e+00> : vector<8x64xf32>
    %5 = tpu.matmul %4, %3, %cst {dimension_numbers = #tpu.dot_dimension_numbers<[1], [0], [0], [1], [0, 0, 1, 1], [], []>} : vector<8x9xf32>, vector<9x64xf32>, vector<8x64xf32> -> vector<8x64xf32>
    %c0_4 = arith.constant 0 : index
    %c0_5 = arith.constant 0 : index
    %6 = vector.load %arg3[%c0_4, %c0_5] : memref<8x1xf32, #tpu.memory_space<vmem>>, vector<8x1xf32>
    %7 = vector.broadcast %6 : vector<8x1xf32> to vector<8x64xf32>
    %8 = arith.addf %5, %7 : vector<8x64xf32>
    %cst_6 = arith.constant 0.000000e+00 : f32
    %9 = vector.broadcast %cst_6 : f32 to vector<8x64xf32>
    %10 = arith.maximumf %8, %9 : vector<8x64xf32>
    %c0_7 = arith.constant 0 : index
    %c0_8 = arith.constant 0 : index
    %11 = vector.load %arg4[%c0_7, %c0_8] : memref<16x8xf32, #tpu.memory_space<vmem>>, vector<16x8xf32>
    %cst_9 = arith.constant dense<0.000000e+00> : vector<16x64xf32>
    %12 = tpu.matmul %11, %10, %cst_9 {dimension_numbers = #tpu.dot_dimension_numbers<[1], [0], [0], [1], [0, 0, 1, 1], [], []>} : vector<16x8xf32>, vector<8x64xf32>, vector<16x64xf32> -> vector<16x64xf32>
    %c0_10 = arith.constant 0 : index
    %c0_11 = arith.constant 0 : index
    %13 = vector.load %arg5[%c0_10, %c0_11] : memref<16x9xf32, #tpu.memory_space<vmem>>, vector<16x9xf32>
    %cst_12 = arith.constant dense<0.000000e+00> : vector<16x64xf32>
    %14 = tpu.matmul %13, %3, %cst_12 {dimension_numbers = #tpu.dot_dimension_numbers<[1], [0], [0], [1], [0, 0, 1, 1], [], []>} : vector<16x9xf32>, vector<9x64xf32>, vector<16x64xf32> -> vector<16x64xf32>
    %15 = arith.addf %12, %14 : vector<16x64xf32>
    %c0_13 = arith.constant 0 : index
    %c0_14 = arith.constant 0 : index
    %16 = vector.load %arg6[%c0_13, %c0_14] : memref<16x1xf32, #tpu.memory_space<vmem>>, vector<16x1xf32>
    %17 = vector.broadcast %16 : vector<16x1xf32> to vector<16x64xf32>
    %18 = arith.addf %15, %17 : vector<16x64xf32>
    %c0_15 = arith.constant 0 : index
    %c0_16 = arith.constant 0 : index
    %19 = vector.load %arg7[%c0_15, %c0_16] : memref<16x1xf32, #tpu.memory_space<vmem>>, vector<16x1xf32>
    %cst_17 = arith.constant dense<0.000000e+00> : vector<16xf32>
    %20 = vector.multi_reduction <add>, %18, %cst_17 [1] : vector<16x64xf32> to vector<16xf32>
    %21 = vector.shape_cast %20 : vector<16xf32> to vector<16x1xf32>
    %22 = arith.addf %19, %21 : vector<16x1xf32>
    %c0_18 = arith.constant 0 : index
    %c0_19 = arith.constant 0 : index
    %23 = vector.load %arg7[%c0_18, %c0_19] : memref<16x1xf32, #tpu.memory_space<vmem>>, vector<16x1xf32>
    tpu.vector_store %arg7[%c0_18, %c0_19], %22 {strides = array<i32>} : memref<16x1xf32, #tpu.memory_space<vmem>>, vector<16x1xf32>,
    %c0_20 = arith.constant 0 : index
    %c0_21 = arith.constant 0 : index
    %24 = vector.load %arg8[%c0_20, %c0_21] : memref<16x1xf32, #tpu.memory_space<vmem>>, vector<16x1xf32>
    %25 = arith.mulf %18, %18 : vector<16x64xf32>
    %cst_22 = arith.constant dense<0.000000e+00> : vector<16xf32>
    %26 = vector.multi_reduction <add>, %25, %cst_22 [1] : vector<16x64xf32> to vector<16xf32>
    %27 = vector.shape_cast %26 : vector<16xf32> to vector<16x1xf32>
    %28 = arith.addf %24, %27 : vector<16x1xf32>
    %c0_23 = arith.constant 0 : index
    %c0_24 = arith.constant 0 : index
    %29 = vector.load %arg8[%c0_23, %c0_24] : memref<16x1xf32, #tpu.memory_space<vmem>>, vector<16x1xf32>
    tpu.vector_store %arg8[%c0_23, %c0_24], %28 {strides = array<i32>} : memref<16x1xf32, #tpu.memory_space<vmem>>, vector<16x1xf32>,
    return
  }
  func.func @transform_0(%arg0: i32) -> (i32, i32) {
    %c0_i32 = arith.constant 0 : i32
    %c0_i32_0 = arith.constant 0 : i32
    return %c0_i32, %arg0 : i32, i32
  }
  func.func @transform_1(%arg0: i32) -> (i32, i32) {
    %c0_i32 = arith.constant 0 : i32
    %c0_i32_0 = arith.constant 0 : i32
    %c0_i32_1 = arith.constant 0 : i32
    return %c0_i32, %c0_i32_0 : i32, i32
  }
  func.func @transform_2(%arg0: i32) -> (i32, i32) {
    %c0_i32 = arith.constant 0 : i32
    %c0_i32_0 = arith.constant 0 : i32
    %c0_i32_1 = arith.constant 0 : i32
    return %c0_i32, %c0_i32_0 : i32, i32
  }
  func.func @transform_3(%arg0: i32) -> (i32, i32) {
    %c0_i32 = arith.constant 0 : i32
    %c0_i32_0 = arith.constant 0 : i32
    %c0_i32_1 = arith.constant 0 : i32
    return %c0_i32, %c0_i32_0 : i32, i32
  }
  func.func @transform_4(%arg0: i32) -> (i32, i32) {
    %c0_i32 = arith.constant 0 : i32
    %c0_i32_0 = arith.constant 0 : i32
    %c0_i32_1 = arith.constant 0 : i32
    return %c0_i32, %c0_i32_0 : i32, i32
  }
  func.func @transform_5(%arg0: i32) -> (i32, i32) {
    %c0_i32 = arith.constant 0 : i32
    %c0_i32_0 = arith.constant 0 : i32
    %c0_i32_1 = arith.constant 0 : i32
    return %c0_i32, %c0_i32_0 : i32, i32
  }
  func.func @transform_6(%arg0: i32) -> (i32, i32) {
    %c0_i32 = arith.constant 0 : i32
    %c0_i32_0 = arith.constant 0 : i32
    %c0_i32_1 = arith.constant 0 : i32
    return %c0_i32, %c0_i32_0 : i32, i32
  }
  func.func @transform_7(%arg0: i32) -> (i32, i32) {
    %c0_i32 = arith.constant 0 : i32
    %c0_i32_0 = arith.constant 0 : i32
    %c0_i32_1 = arith.constant 0 : i32
    return %c0_i32, %c0_i32_0 : i32, i32
  }
}

module attributes {stable_mosaic.version = 11 : i64} {
  func.func @_output_kernel(%arg0: i32, %arg1: memref<9x64xf32, #tpu.memory_space<vmem>>, %arg2: memref<8x9xf32, #tpu.memory_space<vmem>>, %arg3: memref<8x1xf32, #tpu.memory_space<vmem>>, %arg4: memref<16x8xf32, #tpu.memory_space<vmem>>, %arg5: memref<16x9xf32, #tpu.memory_space<vmem>>, %arg6: memref<16x1xf32, #tpu.memory_space<vmem>>, %arg7: memref<32x16xf32, #tpu.memory_space<vmem>>, %arg8: memref<32x1xf32, #tpu.memory_space<vmem>>, %arg9: memref<32x64xf32, #tpu.memory_space<vmem>>) attributes {dimension_semantics = [#tpu.dimension_semantics<parallel>], iteration_bounds = array<i64: 1>, scalar_prefetch = 0 : i64, scratch_operands = 0 : i64, tpu.core_type = #tpu.core_type<tc>, window_params = [{transform_indices = @transform_0, window_bounds = array<i64: 9, 64>}, {pipeline_mode = #tpu.pipeline_mode<synchronous>, transform_indices = @transform_1, window_bounds = array<i64: 8, 9>}, {pipeline_mode = #tpu.pipeline_mode<synchronous>, transform_indices = @transform_2, window_bounds = array<i64: 8, 1>}, {pipeline_mode = #tpu.pipeline_mode<synchronous>, transform_indices = @transform_3, window_bounds = array<i64: 16, 8>}, {pipeline_mode = #tpu.pipeline_mode<synchronous>, transform_indices = @transform_4, window_bounds = array<i64: 16, 9>}, {pipeline_mode = #tpu.pipeline_mode<synchronous>, transform_indices = @transform_5, window_bounds = array<i64: 16, 1>}, {pipeline_mode = #tpu.pipeline_mode<synchronous>, transform_indices = @transform_6, window_bounds = array<i64: 32, 16>}, {pipeline_mode = #tpu.pipeline_mode<synchronous>, transform_indices = @transform_7, window_bounds = array<i64: 32, 1>}, {transform_indices = @transform_8, window_bounds = array<i64: 32, 64>}]} {
    %c0 = arith.constant 0 : index
    %c0_0 = arith.constant 0 : index
    %0 = vector.load %arg1[%c0, %c0_0] : memref<9x64xf32, #tpu.memory_space<vmem>>, vector<9x64xf32>
    %c0_1 = arith.constant 0 : index
    %c0_2 = arith.constant 0 : index
    %1 = vector.load %arg2[%c0_1, %c0_2] : memref<8x9xf32, #tpu.memory_space<vmem>>, vector<8x9xf32>
    %cst = arith.constant dense<0.000000e+00> : vector<8x64xf32>
    %2 = tpu.matmul %1, %0, %cst {dimension_numbers = #tpu.dot_dimension_numbers<[1], [0], [0], [1], [0, 0, 1, 1], [], []>} : vector<8x9xf32>, vector<9x64xf32>, vector<8x64xf32> -> vector<8x64xf32>
    %c0_3 = arith.constant 0 : index
    %c0_4 = arith.constant 0 : index
    %3 = vector.load %arg3[%c0_3, %c0_4] : memref<8x1xf32, #tpu.memory_space<vmem>>, vector<8x1xf32>
    %4 = vector.broadcast %3 : vector<8x1xf32> to vector<8x64xf32>
    %5 = arith.addf %2, %4 : vector<8x64xf32>
    %cst_5 = arith.constant 0.000000e+00 : f32
    %6 = vector.broadcast %cst_5 : f32 to vector<8x64xf32>
    %7 = arith.maximumf %5, %6 : vector<8x64xf32>
    %c0_6 = arith.constant 0 : index
    %c0_7 = arith.constant 0 : index
    %8 = vector.load %arg4[%c0_6, %c0_7] : memref<16x8xf32, #tpu.memory_space<vmem>>, vector<16x8xf32>
    %cst_8 = arith.constant dense<0.000000e+00> : vector<16x64xf32>
    %9 = tpu.matmul %8, %7, %cst_8 {dimension_numbers = #tpu.dot_dimension_numbers<[1], [0], [0], [1], [0, 0, 1, 1], [], []>} : vector<16x8xf32>, vector<8x64xf32>, vector<16x64xf32> -> vector<16x64xf32>
    %c0_9 = arith.constant 0 : index
    %c0_10 = arith.constant 0 : index
    %10 = vector.load %arg5[%c0_9, %c0_10] : memref<16x9xf32, #tpu.memory_space<vmem>>, vector<16x9xf32>
    %cst_11 = arith.constant dense<0.000000e+00> : vector<16x64xf32>
    %11 = tpu.matmul %10, %0, %cst_11 {dimension_numbers = #tpu.dot_dimension_numbers<[1], [0], [0], [1], [0, 0, 1, 1], [], []>} : vector<16x9xf32>, vector<9x64xf32>, vector<16x64xf32> -> vector<16x64xf32>
    %12 = arith.addf %9, %11 : vector<16x64xf32>
    %c0_12 = arith.constant 0 : index
    %c0_13 = arith.constant 0 : index
    %13 = vector.load %arg6[%c0_12, %c0_13] : memref<16x1xf32, #tpu.memory_space<vmem>>, vector<16x1xf32>
    %14 = vector.broadcast %13 : vector<16x1xf32> to vector<16x64xf32>
    %15 = arith.addf %12, %14 : vector<16x64xf32>
    %cst_14 = arith.constant 0.000000e+00 : f32
    %16 = vector.broadcast %cst_14 : f32 to vector<16x64xf32>
    %17 = arith.maximumf %15, %16 : vector<16x64xf32>
    %c0_15 = arith.constant 0 : index
    %c0_16 = arith.constant 0 : index
    %18 = vector.load %arg7[%c0_15, %c0_16] : memref<32x16xf32, #tpu.memory_space<vmem>>, vector<32x16xf32>
    %cst_17 = arith.constant dense<0.000000e+00> : vector<32x64xf32>
    %19 = tpu.matmul %18, %17, %cst_17 {dimension_numbers = #tpu.dot_dimension_numbers<[1], [0], [0], [1], [0, 0, 1, 1], [], []>} : vector<32x16xf32>, vector<16x64xf32>, vector<32x64xf32> -> vector<32x64xf32>
    %c0_18 = arith.constant 0 : index
    %c0_19 = arith.constant 0 : index
    %20 = vector.load %arg8[%c0_18, %c0_19] : memref<32x1xf32, #tpu.memory_space<vmem>>, vector<32x1xf32>
    %21 = vector.broadcast %20 : vector<32x1xf32> to vector<32x64xf32>
    %22 = arith.addf %19, %21 : vector<32x64xf32>
    %c0_20 = arith.constant 0 : index
    %c0_21 = arith.constant 0 : index
    %23 = vector.load %arg9[%c0_20, %c0_21] : memref<32x64xf32, #tpu.memory_space<vmem>>, vector<32x64xf32>
    tpu.vector_store %arg9[%c0_20, %c0_21], %22 {strides = array<i32>} : memref<32x64xf32, #tpu.memory_space<vmem>>, vector<32x64xf32>,
    return
  }
  func.func @transform_0(%arg0: i32) -> (i32, i32) {
    %c0_i32 = arith.constant 0 : i32
    %c0_i32_0 = arith.constant 0 : i32
    return %c0_i32, %arg0 : i32, i32
  }
  func.func @transform_1(%arg0: i32) -> (i32, i32) {
    %c0_i32 = arith.constant 0 : i32
    %c0_i32_0 = arith.constant 0 : i32
    %c0_i32_1 = arith.constant 0 : i32
    return %c0_i32, %c0_i32_0 : i32, i32
  }
  func.func @transform_2(%arg0: i32) -> (i32, i32) {
    %c0_i32 = arith.constant 0 : i32
    %c0_i32_0 = arith.constant 0 : i32
    %c0_i32_1 = arith.constant 0 : i32
    return %c0_i32, %c0_i32_0 : i32, i32
  }
  func.func @transform_3(%arg0: i32) -> (i32, i32) {
    %c0_i32 = arith.constant 0 : i32
    %c0_i32_0 = arith.constant 0 : i32
    %c0_i32_1 = arith.constant 0 : i32
    return %c0_i32, %c0_i32_0 : i32, i32
  }
  func.func @transform_4(%arg0: i32) -> (i32, i32) {
    %c0_i32 = arith.constant 0 : i32
    %c0_i32_0 = arith.constant 0 : i32
    %c0_i32_1 = arith.constant 0 : i32
    return %c0_i32, %c0_i32_0 : i32, i32
  }
  func.func @transform_5(%arg0: i32) -> (i32, i32) {
    %c0_i32 = arith.constant 0 : i32
    %c0_i32_0 = arith.constant 0 : i32
    %c0_i32_1 = arith.constant 0 : i32
    return %c0_i32, %c0_i32_0 : i32, i32
  }
  func.func @transform_6(%arg0: i32) -> (i32, i32) {
    %c0_i32 = arith.constant 0 : i32
    %c0_i32_0 = arith.constant 0 : i32
    %c0_i32_1 = arith.constant 0 : i32
    return %c0_i32, %c0_i32_0 : i32, i32
  }
  func.func @transform_7(%arg0: i32) -> (i32, i32) {
    %c0_i32 = arith.constant 0 : i32
    %c0_i32_0 = arith.constant 0 : i32
    %c0_i32_1 = arith.constant 0 : i32
    return %c0_i32, %c0_i32_0 : i32, i32
  }
  func.func @transform_8(%arg0: i32) -> (i32, i32) {
    %c0_i32 = arith.constant 0 : i32
    %c0_i32_0 = arith.constant 0 : i32
    return %c0_i32, %arg0 : i32, i32
  }
}

</mosaic_0001>

<bundles_post_ra>
// kernel: road2embedding_forward.2
= control target key start
LH: loop header
LB: loop body
LE: loop exit
PB: predicated region body
PF: predicated region fallthrough
CT: control target
= control target key end

     0   :  { %vm47_vm0 = vcmask 1040384   ;;  %v394_v0 = vmov 0.0|0.0   ;;  %vm395_vm1 = vmmov 1   ;;  %vm396_vm3 = vmmov 0   ;;  %s523_s0 = inlined_call_operand.vmem [shape: f32[9,64], index: 0, kind: input, shape index: {}]   ;;  %s524_s2 = inlined_call_operand.vmem [shape: f32[8,1], index: 2, kind: input, shape index: {}]   ;;  %s525_s1 = inlined_call_operand.vmem [shape: f32[8,9], index: 1, kind: input, shape index: {}]   ;;  %s526_s5 = inlined_call_operand.vmem [shape: f32[16,1], index: 5, kind: input, shape index: {}]   ;;  %s527_s4 = inlined_call_operand.vmem [shape: f32[16,9], index: 4, kind: input, shape index: {}]   ;;  %s528_s3 = inlined_call_operand.vmem [shape: f32[16,8], index: 3, kind: input, shape index: {}]   ;;  %s529_s6 = inlined_call_operand.vmem [shape: f32[16,1], index: 6, kind: output, shape index: {0}]   ;;  %s530_s7 = inlined_call_operand.vmem [shape: f32[16,1], index: 7, kind: output, shape index: {1}]  }
   0x1   :  { %375 = vmatprep.subr.bf16.mxu0 %v394_v0  ;;  %v34_v1 = vld [vmem:[%s523_s0] sm:$0xff]  ;;  %v35_v2 = vld [vmem:[%s523_s0 + $0x8] sm:$0x1]  ;;  %vm445_vm2 = vmpackc.low %vm47_vm0, %vm395_vm1  ;;  %v397_v5 = vmov 0.0   ;;  %v398_v6 = vmov 0   ;;  %vm43_vm4 = vcmask 72704  }
   0x2   :  { %v376_v4 = vpack.c.bf16 %v35_v2, %v34_v1  ;;  %360 = vmatprep.mubr.msk.f32.mxu0 %vm396_vm3, %v397_v5  ;;  %392 = vset.pattern.permute.xlu0 %v398_v6  ;;  %v37_v7 = vld [vmem:[%s524_s2] sm:$0xff]  ;;  %v125_v11 = vld [vmem:[%s527_s4 + $0x8] sm:$0xff]  ;;  %vm207_vm5 = vcmask 64512   ;;  %vm29_vm6 = vcmask 7168   ;;  %vm305_vm7 = vcmask 523264  }
   0x3   :  { %40 = vperm.xlu0 %392, %v37_v7   ;;  %v124_v8 = vld [vmem:[%s527_s4] sm:$0xff]  ;;  %393 = vset.pattern.permute.xlu1 %v398_v6  ;;  %v290_v13 = vld [vmem:[%s526_s5 + $0x8] sm:$0xff]  ;;  %31 = vst.msk [vmem:[%s529_s6 + $0x8] sm:$0xff] %vm29_vm6, %v397_v5  ;;  %30 = vst.msk [vmem:[%s529_s6] sm:$0xff] %vm29_vm6, %v397_v5 }
   0x4   :  { %378 = vmatpush3.bf16.msk.msra.mxu0 %vm445_vm2, %v376_v4  ;;  %v36_v9 = vld [vmem:[%s525_s1] sm:$0xff]  ;;  %381 = vmatprep.subr.msk.bf16.mxu1 %vm445_vm2, %v376_v4  ;;  %v123_v19 = vld [vmem:[%s528_s3 + $0x8] sm:$0xff]  ;;  %32 = vst.msk [vmem:[%s530_s7] sm:$0xff] %vm29_vm6, %v397_v5  ;;  %33 = vst.msk [vmem:[%s530_s7 + $0x8] sm:$0xff] %vm29_vm6, %v397_v5 }
   0x5   :  { %v289_v10 = vld [vmem:[%s526_s5] sm:$0xff]  ;;  %384 = vmatpush3.bf16.msk.msra.mxu1 %vm445_vm2, %v376_v4  ;;  %367 = vmatprep.mubr.msk.f32.mxu1 %vm43_vm4, %v124_v8 }
   0x6   :  { %v122_v12 = vld [vmem:[%s528_s3] sm:$0xff]  ;;  %298 = vperm.xlu1 %393, %v290_v13  }
   0x7   :  { %361 = vmatmul.mubr.msk.f32.vlgmr.msra.gmra.mrb[0].mxu0 %vm43_vm4, %v36_v9  ;;  %293 = vperm.xlu0 %392, %v289_v10  }
   0x8   :  { %368 = vmatmul.mubr.msk.f32.vlgmr.msra.gmra.mrb[0].mxu1 %vm43_vm4, %v125_v11 }
   0x9   :  { %372 = vmatprep.mubr.msk.f32.mxu1 %vm207_vm5, %v122_v12 }
   0xa   :  { %v304_v32 = vld [vmem:[%s529_s6 + $0x8] sm:$0xff]  ;;  %v303_v33 = vld [vmem:[%s529_s6] sm:$0xff] }
   0xb   :  { %v317_v38 = vld [vmem:[%s530_s7] sm:$0xff]  ;;  %v318_v39 = vld [vmem:[%s530_s7 + $0x8] sm:$0xff] }
  0x82   :  { %v41_v14 = vpop.permute.xlu0 %40 }
  0x85   :  { %v299_v20 = vpop.permute.xlu1 %298 }
  0x86   :  { %v294_v22 = vpop.permute.xlu0 %293 }
  0xda   :  { %v117_v15 = vpop.f32.mrb[0].mxu0 }
  0xdb   :  { %v118_v16 = vadd.f32 %v117_v15, %v41_v14  ;;  %v362_v17 = vpop.f32.mrb[1].mxu0 }
  0xdd   :  { %v121_v18 = vmax.f32 %v118_v16, 0.0 }
  0xdf   :  { %370 = vmatprep.subr.mxu1 %v121_v18 }
  0xe0   :  { %371 = vmatpush3.msra.mxu1 %v121_v18 }
  0xe1   :  { %373 = vmatmul.mubr.msk.f32.vlgmr.msra.gmra.mrb[0].mxu1 %vm207_vm5, %v123_v19 }
 0x1b4   :  { %v374_v21 = vpop.f32.mrb[0].mxu1 }
 0x1b5   :  { %v302_v23 = vadd.f32 %v374_v21, %v299_v20  ;;  %v280_v24 = vpop.f32.mrb[1].mxu1 }
 0x1b6   :  { %v301_v25 = vadd.f32 %v294_v22, %v280_v24 }
 0x1b7   :  { %v309_v26 = vsel %vm305_vm7, %v302_v23, 0.0  ;;  %v320_v29 = vmul.f32 %v302_v23, %v302_v23 }
 0x1b8   :  { %310 = vadd.xlane.f32.xlu0 %v309_v26  ;;  %v306_v27 = vsel %vm305_vm7, %v301_v25, 0.0  ;;  %v319_v28 = vmul.f32 %v301_v25, %v301_v25 }
 0x1b9   :  { %307 = vadd.xlane.f32.xlu1 %v306_v27  ;;  %v324_v31 = vsel %vm305_vm7, %v320_v29, 0.0 }
 0x1ba   :  { %v321_v30 = vsel %vm305_vm7, %v319_v28, 0.0 }
 0x1bc   :  { %322 = vadd.xlane.f32.xlu0 %v321_v30 }
 0x1bd   :  { %325 = vadd.xlane.f32.xlu1 %v324_v31 }
 0x245   :  { %v311_v34 = vpop.xlane.xlu0 %310 }
 0x246   :  { %v313_v35 = vadd.f32 %v311_v34, %v304_v32  ;;  %v308_v36 = vpop.xlane.xlu1 %307 }
 0x247   :  { %v312_v37 = vadd.f32 %v308_v36, %v303_v33 }
 0x248   :  { %316 = vst.msk [vmem:[%s529_s6 + $0x8] sm:$0xff] %vm29_vm6, %v313_v35 }
 0x249   :  { %315 = vst.msk [vmem:[%s529_s6] sm:$0xff] %vm29_vm6, %v312_v37  ;;  %v323_v40 = vpop.xlane.xlu0 %322 }
 0x24a   :  { %v327_v41 = vadd.f32 %v323_v40, %v317_v38  ;;  %v326_v42 = vpop.xlane.xlu1 %325 }
 0x24b   :  { %v328_v43 = vadd.f32 %v326_v42, %v318_v39 }
 0x24c   :  { %329 = vst.msk [vmem:[%s530_s7] sm:$0xff] %vm29_vm6, %v327_v41 }
 0x24d   :  { %330 = vst.msk [vmem:[%s530_s7 + $0x8] sm:$0xff] %vm29_vm6, %v328_v43 }

// kernel: road2embedding_forward.3
= control target key start
LH: loop header
LB: loop body
LE: loop exit
PB: predicated region body
PF: predicated region fallthrough
CT: control target
= control target key end

     0   :  { %vm42_vm0 = vcmask 1040384   ;;  %v514_v0 = vmov 0.0|0.0   ;;  %vm515_vm1 = vmmov 1   ;;  %vm516_vm3 = vmmov 0   ;;  %s646_s0 = inlined_call_operand.vmem [shape: f32[9,64], index: 0, kind: input, shape index: {}]   ;;  %s647_s2 = inlined_call_operand.vmem [shape: f32[8,1], index: 2, kind: input, shape index: {}]   ;;  %s648_s1 = inlined_call_operand.vmem [shape: f32[8,9], index: 1, kind: input, shape index: {}]   ;;  %s649_s5 = inlined_call_operand.vmem [shape: f32[16,1], index: 5, kind: input, shape index: {}]   ;;  %s650_s7 = inlined_call_operand.vmem [shape: f32[32,1], index: 7, kind: input, shape index: {}]   ;;  %s651_s4 = inlined_call_operand.vmem [shape: f32[16,9], index: 4, kind: input, shape index: {}]   ;;  %s652_s3 = inlined_call_operand.vmem [shape: f32[16,8], index: 3, kind: input, shape index: {}]   ;;  %s653_s6 = inlined_call_operand.vmem [shape: f32[32,16], index: 6, kind: input, shape index: {}]   ;;  %s654_s8 = inlined_call_operand.vmem [shape: f32[32,64], index: 8, kind: output, shape index: {}]  }
   0x1   :  { %491 = vmatprep.subr.bf16.mxu0 %v514_v0  ;;  %v29_v1 = vld [vmem:[%s646_s0] sm:$0xff]  ;;  %v30_v2 = vld [vmem:[%s646_s0 + $0x8] sm:$0x1]  ;;  %vm570_vm2 = vmpackc.low %vm42_vm0, %vm515_vm1  ;;  %v517_v5 = vmov 0.0   ;;  %v518_v6 = vmov 0   ;;  %vm38_vm4 = vcmask 72704  }
   0x2   :  { %v492_v4 = vpack.c.bf16 %v30_v2, %v29_v1  ;;  %466 = vmatprep.mubr.msk.f32.mxu0 %vm516_vm3, %v517_v5  ;;  %512 = vset.pattern.permute.xlu0 %v518_v6  ;;  %v32_v7 = vld [vmem:[%s647_s2] sm:$0xff]  ;;  %v305_v10 = vld [vmem:[%s650_s7 + $0x8] sm:$0xff]  ;;  %v307_v13 = vld [vmem:[%s650_s7 + $0x18] sm:$0xff]  ;;  %vm202_vm5 = vcmask 64512   ;;  %vm328_vm6 = vcmask 130048   ;;  %vm426_vm7 = vcmask 523264  }
   0x3   :  { %35 = vperm.xlu0 %512, %v32_v7   ;;  %513 = vset.pattern.permute.xlu1 %v518_v6  ;;  %v31_v8 = vld [vmem:[%s648_s1] sm:$0xff]  ;;  %v120_v12 = vld [vmem:[%s651_s4 + $0x8] sm:$0xff]  ;;  %v306_v17 = vld [vmem:[%s650_s7 + $0x10] sm:$0xff] }
   0x4   :  { %494 = vmatpush3.bf16.msk.msra.mxu0 %vm570_vm2, %v492_v4  ;;  %v284_v9 = vld [vmem:[%s649_s5] sm:$0xff]  ;;  %497 = vmatprep.subr.msk.bf16.mxu1 %vm570_vm2, %v492_v4  ;;  %v285_v15 = vld [vmem:[%s649_s5 + $0x8] sm:$0xff]  ;;  %v302_v35 = vld [vmem:[%s653_s6 + $0x10] sm:$0xff] }
   0x5   :  { %500 = vmatpush3.bf16.msk.msra.mxu1 %vm570_vm2, %v492_v4  ;;  %v119_v11 = vld [vmem:[%s651_s4] sm:$0xff]  ;;  %293 = vperm.xlu1 %513, %v285_v15   ;;  %v118_v23 = vld [vmem:[%s652_s3 + $0x8] sm:$0xff]  ;;  %v303_v36 = vld [vmem:[%s653_s6 + $0x18] sm:$0xff] }
   0x6   :  { %473 = vmatprep.mubr.msk.f32.mxu1 %vm38_vm4, %v119_v11  ;;  %v117_v14 = vld [vmem:[%s652_s3] sm:$0xff]  ;;  %v301_v34 = vld [vmem:[%s653_s6 + $0x8] sm:$0xff] }
   0x7   :  { %467 = vmatmul.mubr.msk.f32.vlgmr.msra.gmra.mrb[0].mxu0 %vm38_vm4, %v31_v8  ;;  %288 = vperm.xlu0 %512, %v284_v9   ;;  %v304_v16 = vld [vmem:[%s650_s7] sm:$0xff] }
   0x8   :  { %474 = vmatmul.mubr.msk.f32.vlgmr.msra.gmra.mrb[0].mxu1 %vm38_vm4, %v120_v12  ;;  %v300_v24 = vld [vmem:[%s653_s6] sm:$0xff] }
   0x9   :  { %478 = vmatprep.mubr.msk.f32.mxu1 %vm202_vm5, %v117_v14  ;;  %310 = vperm.xlu1 %513, %v304_v16  }
   0xa   :  { %485 = vmatprep.mubr.msk.f32.mxu0 %vm328_vm6, %v300_v24 }
   0xb   :  { %315 = vperm.xlu0 %512, %v305_v10  }
   0xd   :  { %320 = vperm.xlu1 %513, %v306_v17  }
   0xf   :  { %325 = vperm.xlu0 %512, %v307_v13  }
  0x82   :  { %v36_v18 = vpop.permute.xlu0 %35 }
  0x84   :  { %v294_v25 = vpop.permute.xlu1 %293 }
  0x86   :  { %v289_v27 = vpop.permute.xlu0 %288 }
  0x88   :  { %v311_v38 = vpop.permute.xlu1 %310 }
  0x8a   :  { %v316_v37 = vpop.permute.xlu0 %315 }
  0x8c   :  { %v321_v45 = vpop.permute.xlu1 %320 }
  0x8e   :  { %v326_v43 = vpop.permute.xlu0 %325 }
  0xda   :  { %v112_v19 = vpop.f32.mrb[0].mxu0 }
  0xdb   :  { %v113_v20 = vadd.f32 %v112_v19, %v36_v18  ;;  %v468_v21 = vpop.f32.mrb[1].mxu0 }
  0xdd   :  { %v116_v22 = vmax.f32 %v113_v20, 0.0 }
  0xdf   :  { %476 = vmatprep.subr.mxu1 %v116_v22 }
  0xe0   :  { %477 = vmatpush3.msra.mxu1 %v116_v22 }
  0xe1   :  { %479 = vmatmul.mubr.msk.f32.vlgmr.msra.gmra.mrb[0].mxu1 %vm202_vm5, %v118_v23 }
 0x1b4   :  { %v480_v26 = vpop.f32.mrb[0].mxu1 }
 0x1b5   :  { %v297_v28 = vadd.f32 %v480_v26, %v294_v25  ;;  %v275_v29 = vpop.f32.mrb[1].mxu1 }
 0x1b6   :  { %v296_v30 = vadd.f32 %v289_v27, %v275_v29 }
 0x1b7   :  { %v299_v31 = vmax.f32 %v297_v28, 0.0 }
 0x1b8   :  { %v298_v32 = vmax.f32 %v296_v30, 0.0 }
 0x1ba   :  { %v501_v33 = vpack.c.bf16 %v299_v31, %v298_v32 }
 0x1bc   :  { %502 = vmatprep.subr.bf16.mxu0 %v501_v33 }
 0x1bd   :  { %504 = vmatpush3.bf16.msra.mxu0 %v501_v33 }
 0x1c0   :  { %486 = vmatmul.mubr.msk.f32.vlgmr.msra.gmra.mrb[2].mxu0 %vm328_vm6, %v301_v34 }
 0x1c1   :  { %488 = vmatprep.mubr.msk.f32.mxu0 %vm328_vm6, %v302_v35 }
 0x1c4   :  { %489 = vmatmul.mubr.msk.f32.gmra.mrb[4].mxu0 %vm328_vm6, %v303_v36 }
 0x293   :  { %v487_v39 = vpop.f32.mrb[2].mxu0 }
 0x294   :  { %v413_v40 = vadd.f32 %v487_v39, %v316_v37  ;;  %v407_v41 = vpop.f32.mrb[3].mxu0 }
 0x295   :  { %v408_v42 = vadd.f32 %v407_v41, %v311_v38 }
 0x296   :  { %428 = vst.msk [vmem:[%s654_s8 + $0x8] sm:$0xff] %vm426_vm7, %v413_v40 }
 0x297   :  { %427 = vst.msk [vmem:[%s654_s8] sm:$0xff] %vm426_vm7, %v408_v42  ;;  %v490_v44 = vpop.f32.mrb[4].mxu0 }
 0x298   :  { %v423_v46 = vadd.f32 %v490_v44, %v326_v43  ;;  %v417_v47 = vpop.f32.mrb[5].mxu0 }
 0x299   :  { %v418_v48 = vadd.f32 %v417_v47, %v321_v45 }
 0x29a   :  { %430 = vst.msk [vmem:[%s654_s8 + $0x18] sm:$0xff] %vm426_vm7, %v423_v46 }
 0x29b   :  { %429 = vst.msk [vmem:[%s654_s8 + $0x10] sm:$0xff] %vm426_vm7, %v418_v48 }

</bundles_post_ra>
